<compile_context>
chip_gen: v5e
topology: v5e:2x2
jax: 0.10.0
libtpu: 0.0.40
codegen_flags: <defaults>
</compile_context>

<pallas_src>
import functools

import jax
import jax.numpy as jnp
from jax.experimental import pallas as pl
from jax.experimental.pallas import tpu as pltpu


# ----------------------------------------------------------------------------
# Fused Pallas kernel: mask -> avgpool -> channel MLP (x2) -> recombine
# ----------------------------------------------------------------------------
def _sam_kernel(x_ref, wp_ref, wn_ref,
                w1p_ref, b1p_ref, w2p_ref, b2p_ref,
                w1n_ref, b1n_ref, w2n_ref, b2n_ref,
                o_ref, *, inv_hw):
    """One batch element.

    x_ref:  (C, HW)    input activations (channel-major, spatial flattened on lanes)
    wp_ref: (1, HW)    positive spatial weight map (broadcast over channels)
    wn_ref: (1, HW)    negative spatial weight map
    w1*:    (Cr, C)    first 1x1-conv weight   b1*: (Cr, 1)
    w2*:    (C, Cr)    second 1x1-conv weight  b2*: (C, 1)
    o_ref:  (C, HW)
    """
    x = x_ref[...]                         # (C, HW)
    xp = x * wp_ref[...]                   # sublane-broadcast of (1, HW)
    xn = x * wn_ref[...]

    # AdaptiveAvgPool2d(1): mean over spatial -> per-channel column vector (C, 1).
    yp = jnp.sum(xp, axis=-1, keepdims=True) * inv_hw
    yn = jnp.sum(xn, axis=-1, keepdims=True) * inv_hw

    def channel_mlp(y, w1, b1, w2, b2):
        # 1x1 conv on a (C,1,1) tensor == dense layer; column-vector form keeps the
        # pooled vector in its natural (C-on-sublanes) layout (no transpose needed).
        h = jnp.dot(w1, y, preferred_element_type=jnp.float32) + b1     # (Cr, 1)
        h = jnp.maximum(h, 0.0)                                          # ReLU
        a = jnp.dot(w2, h, preferred_element_type=jnp.float32) + b2     # (C, 1)
        return 1.0 / (1.0 + jnp.exp(-a))                                 # Sigmoid (EUP)

    ap = channel_mlp(yp, w1p_ref[...], b1p_ref[...], w2p_ref[...], b2p_ref[...])  # (C,1)
    an = channel_mlp(yn, w1n_ref[...], b1n_ref[...], w2n_ref[...], b2n_ref[...])  # (C,1)

    # Fused epilogue: residual + both reweighted paths, single lane-dense store.
    o_ref[...] = x + xp * ap + xn * an


def sam_layer(x, w_p, w_n, params):
    """x: (N, C, H, W); w_p, w_n: (N, 1, H, W) spatial weight maps. Returns (N, C, H, W)."""
    N, C, H, W = x.shape
    HW = H * W
    Cr = params["w1p"].shape[0]

    # Flatten spatial dims so the lane dimension is H*W (lane-dense for H*W % 128 == 0).
    x2 = x.reshape(N, C, HW)
    wp2 = w_p.reshape(N, 1, HW)
    wn2 = w_n.reshape(N, 1, HW)

    kernel = functools.partial(_sam_kernel, inv_hw=1.0 / HW)
    full = lambda n: (0, 0)  # weights/biases: same (full) block for every grid step

    out = pl.pallas_call(
        kernel,
        grid=(N,),
        in_specs=[
            pl.BlockSpec((None, C, HW), lambda n: (n, 0, 0)),   # x
            pl.BlockSpec((None, 1, HW), lambda n: (n, 0, 0)),   # w_p
            pl.BlockSpec((None, 1, HW), lambda n: (n, 0, 0)),   # w_n
            pl.BlockSpec((Cr, C), full),                        # w1p
            pl.BlockSpec((Cr, 1), full),                        # b1p
            pl.BlockSpec((C, Cr), full),                        # w2p
            pl.BlockSpec((C, 1), full),                         # b2p
            pl.BlockSpec((Cr, C), full),                        # w1n
            pl.BlockSpec((Cr, 1), full),                        # b1n
            pl.BlockSpec((C, Cr), full),                        # w2n
            pl.BlockSpec((C, 1), full),                         # b2n
        ],
        out_specs=pl.BlockSpec((None, C, HW), lambda n: (n, 0, 0)),
        out_shape=jax.ShapeDtypeStruct((N, C, HW), jnp.float32),
        compiler_params=pltpu.CompilerParams(dimension_semantics=("parallel",)),
    )(x2, wp2, wn2,
      params["w1p"], params["b1p"], params["w2p"], params["b2p"],
      params["w1n"], params["b1n"], params["w2n"], params["b2n"])

    return out.reshape(N, C, H, W)


# ----------------------------------------------------------------------------
# Deterministic synthetic parameters (PyTorch Conv2d(k=1) weight layout: (Cout, Cin))
# ----------------------------------------------------------------------------
def build_sam_params(key, channel, reduction):
    cr = channel // reduction
    ks = jax.random.split(key, 8)
    def dense(kw, kb, cout, cin):
        w = jax.random.normal(kw, (cout, cin), jnp.float32) * 0.2
        b = jax.random.normal(kb, (cout, 1), jnp.float32) * 0.1
        return w, b
    w1p, b1p = dense(ks[0], ks[1], cr, channel)
    w2p, b2p = dense(ks[2], ks[3], channel, cr)
    w1n, b1n = dense(ks[4], ks[5], cr, channel)
    w2n, b2n = dense(ks[6], ks[7], channel, cr)
    return dict(w1p=w1p, b1p=b1p, w2p=w2p, b2p=b2p,
                w1n=w1n, b1n=b1n, w2n=w2n, b2n=b2n)


# ----------------------------------------------------------------------------
# Pure-JAX reference for correctness validation
# ----------------------------------------------------------------------------
def sam_layer_ref(x, w_p, w_n, params):
    def mlp(y, w1, b1, w2, b2):
        v = y[:, :, 0, 0]                                     # (N, C)
        h = jnp.maximum(v @ w1.T + b1[:, 0], 0.0)             # (N, Cr)
        a = jax.nn.sigmoid(h @ w2.T + b2[:, 0])               # (N, C)
        return a[:, :, None, None]

    x_p = x * w_p
    y_p = jnp.mean(x_p, axis=(2, 3), keepdims=True)
    y_p = mlp(y_p, params["w1p"], params["b1p"], params["w2p"], params["b2p"])
    x_n = x * w_n
    y_n = jnp.mean(x_n, axis=(2, 3), keepdims=True)
    y_n = mlp(y_n, params["w1n"], params["b1n"], params["w2n"], params["b2n"])
    return x + x_p * y_p + x_n * y_n


# ----------------------------------------------------------------------------
if __name__ == "__main__":
    key = jax.random.PRNGKey(0)
    k_x, k_w, k_p = jax.random.split(key, 3)

    N, C, H, W = 2, 32, 16, 16       # channel divisible by reduction=16 -> Cr=2
    reduction = 16

    x = jax.random.normal(k_x, (N, C, H, W), jnp.float32)
    # Positive / negative spatial attention maps (as in puenet: sigmoid-ed prediction maps).
    w_p = jax.nn.sigmoid(jax.random.normal(k_w, (N, 1, H, W), jnp.float32))
    w_n = 1.0 - w_p
    params = build_sam_params(k_p, C, reduction)

    out = jax.block_until_ready(sam_layer(x, w_p, w_n, params))
    ref = jax.block_until_ready(sam_layer_ref(x, w_p, w_n, params))

    assert out.shape == (N, C, H, W), out.shape
    assert jnp.allclose(out, ref, rtol=1e-2, atol=1e-2), (
        float(jnp.max(jnp.abs(out - ref))))

    print("KERNEL_OK")
</pallas_src>

<mosaic_0001>
module attributes {stable_mosaic.version = 11 : i64} {
  func.func @_sam_kernel(%arg0: i32, %arg1: memref<1x32x256xf32, #tpu.memory_space<vmem>>, %arg2: memref<1x1x256xf32, #tpu.memory_space<vmem>>, %arg3: memref<1x1x256xf32, #tpu.memory_space<vmem>>, %arg4: memref<2x32xf32, #tpu.memory_space<vmem>>, %arg5: memref<2x1xf32, #tpu.memory_space<vmem>>, %arg6: memref<32x2xf32, #tpu.memory_space<vmem>>, %arg7: memref<32x1xf32, #tpu.memory_space<vmem>>, %arg8: memref<2x32xf32, #tpu.memory_space<vmem>>, %arg9: memref<2x1xf32, #tpu.memory_space<vmem>>, %arg10: memref<32x2xf32, #tpu.memory_space<vmem>>, %arg11: memref<32x1xf32, #tpu.memory_space<vmem>>, %arg12: memref<1x32x256xf32, #tpu.memory_space<vmem>>) attributes {dimension_semantics = [#tpu.dimension_semantics<parallel>], iteration_bounds = array<i64: 2>, scalar_prefetch = 0 : i64, scratch_operands = 0 : i64, tpu.core_type = #tpu.core_type<tc>, window_params = [{transform_indices = @transform_0, window_bounds = array<i64: 1, 32, 256>}, {transform_indices = @transform_1, window_bounds = array<i64: 1, 1, 256>}, {transform_indices = @transform_2, window_bounds = array<i64: 1, 1, 256>}, {pipeline_mode = #tpu.pipeline_mode<synchronous>, transform_indices = @transform_3, window_bounds = array<i64: 2, 32>}, {pipeline_mode = #tpu.pipeline_mode<synchronous>, transform_indices = @transform_4, window_bounds = array<i64: 2, 1>}, {pipeline_mode = #tpu.pipeline_mode<synchronous>, transform_indices = @transform_5, window_bounds = array<i64: 32, 2>}, {pipeline_mode = #tpu.pipeline_mode<synchronous>, transform_indices = @transform_6, window_bounds = array<i64: 32, 1>}, {pipeline_mode = #tpu.pipeline_mode<synchronous>, transform_indices = @transform_7, window_bounds = array<i64: 2, 32>}, {pipeline_mode = #tpu.pipeline_mode<synchronous>, transform_indices = @transform_8, window_bounds = array<i64: 2, 1>}, {pipeline_mode = #tpu.pipeline_mode<synchronous>, transform_indices = @transform_9, window_bounds = array<i64: 32, 2>}, {pipeline_mode = #tpu.pipeline_mode<synchronous>, transform_indices = @transform_10, window_bounds = array<i64: 32, 1>}, {transform_indices = @transform_11, window_bounds = array<i64: 1, 32, 256>}]} {
    %c0 = arith.constant 0 : index
    %c0_0 = arith.constant 0 : index
    %c0_1 = arith.constant 0 : index
    %0 = vector.load %arg1[%c0, %c0_0, %c0_1] : memref<1x32x256xf32, #tpu.memory_space<vmem>>, vector<1x32x256xf32>
    %1 = vector.shape_cast %0 : vector<1x32x256xf32> to vector<32x256xf32>
    %c0_2 = arith.constant 0 : index
    %c0_3 = arith.constant 0 : index
    %c0_4 = arith.constant 0 : index
    %2 = vector.load %arg2[%c0_2, %c0_3, %c0_4] : memref<1x1x256xf32, #tpu.memory_space<vmem>>, vector<1x1x256xf32>
    %3 = vector.shape_cast %2 : vector<1x1x256xf32> to vector<1x256xf32>
    %4 = vector.broadcast %3 : vector<1x256xf32> to vector<32x256xf32>
    %5 = arith.mulf %1, %4 : vector<32x256xf32>
    %c0_5 = arith.constant 0 : index
    %c0_6 = arith.constant 0 : index
    %c0_7 = arith.constant 0 : index
    %6 = vector.load %arg3[%c0_5, %c0_6, %c0_7] : memref<1x1x256xf32, #tpu.memory_space<vmem>>, vector<1x1x256xf32>
    %7 = vector.shape_cast %6 : vector<1x1x256xf32> to vector<1x256xf32>
    %8 = vector.broadcast %7 : vector<1x256xf32> to vector<32x256xf32>
    %9 = arith.mulf %1, %8 : vector<32x256xf32>
    %cst = arith.constant dense<0.000000e+00> : vector<32xf32>
    %10 = vector.multi_reduction <add>, %5, %cst [1] : vector<32x256xf32> to vector<32xf32>
    %11 = vector.shape_cast %10 : vector<32xf32> to vector<32x1xf32>
    %cst_8 = arith.constant 3.906250e-03 : f32
    %12 = vector.broadcast %cst_8 : f32 to vector<32x1xf32>
    %13 = arith.mulf %11, %12 : vector<32x1xf32>
    %cst_9 = arith.constant dense<0.000000e+00> : vector<32xf32>
    %14 = vector.multi_reduction <add>, %9, %cst_9 [1] : vector<32x256xf32> to vector<32xf32>
    %15 = vector.shape_cast %14 : vector<32xf32> to vector<32x1xf32>
    %cst_10 = arith.constant 3.906250e-03 : f32
    %16 = vector.broadcast %cst_10 : f32 to vector<32x1xf32>
    %17 = arith.mulf %15, %16 : vector<32x1xf32>
    %c0_11 = arith.constant 0 : index
    %c0_12 = arith.constant 0 : index
    %18 = vector.load %arg4[%c0_11, %c0_12] : memref<2x32xf32, #tpu.memory_space<vmem>>, vector<2x32xf32>
    %c0_13 = arith.constant 0 : index
    %c0_14 = arith.constant 0 : index
    %19 = vector.load %arg5[%c0_13, %c0_14] : memref<2x1xf32, #tpu.memory_space<vmem>>, vector<2x1xf32>
    %c0_15 = arith.constant 0 : index
    %c0_16 = arith.constant 0 : index
    %20 = vector.load %arg6[%c0_15, %c0_16] : memref<32x2xf32, #tpu.memory_space<vmem>>, vector<32x2xf32>
    %c0_17 = arith.constant 0 : index
    %c0_18 = arith.constant 0 : index
    %21 = vector.load %arg7[%c0_17, %c0_18] : memref<32x1xf32, #tpu.memory_space<vmem>>, vector<32x1xf32>
    %cst_19 = arith.constant dense<0.000000e+00> : vector<2x1xf32>
    %22 = tpu.matmul %18, %13, %cst_19 {dimension_numbers = #tpu.dot_dimension_numbers<[1], [0], [0], [1], [0, 0, 1, 1], [], []>} : vector<2x32xf32>, vector<32x1xf32>, vector<2x1xf32> -> vector<2x1xf32>
    %23 = arith.addf %22, %19 : vector<2x1xf32>
    %cst_20 = arith.constant 0.000000e+00 : f32
    %24 = vector.broadcast %cst_20 : f32 to vector<2x1xf32>
    %25 = arith.maximumf %23, %24 : vector<2x1xf32>
    %cst_21 = arith.constant dense<0.000000e+00> : vector<32x1xf32>
    %26 = tpu.matmul %20, %25, %cst_21 {dimension_numbers = #tpu.dot_dimension_numbers<[1], [0], [0], [1], [0, 0, 1, 1], [], []>} : vector<32x2xf32>, vector<2x1xf32>, vector<32x1xf32> -> vector<32x1xf32>
    %27 = arith.addf %26, %21 : vector<32x1xf32>
    %cst_22 = arith.constant 0.000000e+00 : f32
    %28 = vector.broadcast %cst_22 : f32 to vector<32x1xf32>
    %29 = arith.subf %28, %27 : vector<32x1xf32>
    %30 = math.exp %29 : vector<32x1xf32>
    %cst_23 = arith.constant 1.000000e+00 : f32
    %31 = vector.broadcast %cst_23 : f32 to vector<32x1xf32>
    %32 = arith.addf %31, %30 : vector<32x1xf32>
    %cst_24 = arith.constant 1.000000e+00 : f32
    %33 = vector.broadcast %cst_24 : f32 to vector<32x1xf32>
    %34 = arith.divf %33, %32 : vector<32x1xf32>
    %c0_25 = arith.constant 0 : index
    %c0_26 = arith.constant 0 : index
    %35 = vector.load %arg8[%c0_25, %c0_26] : memref<2x32xf32, #tpu.memory_space<vmem>>, vector<2x32xf32>
    %c0_27 = arith.constant 0 : index
    %c0_28 = arith.constant 0 : index
    %36 = vector.load %arg9[%c0_27, %c0_28] : memref<2x1xf32, #tpu.memory_space<vmem>>, vector<2x1xf32>
    %c0_29 = arith.constant 0 : index
    %c0_30 = arith.constant 0 : index
    %37 = vector.load %arg10[%c0_29, %c0_30] : memref<32x2xf32, #tpu.memory_space<vmem>>, vector<32x2xf32>
    %c0_31 = arith.constant 0 : index
    %c0_32 = arith.constant 0 : index
    %38 = vector.load %arg11[%c0_31, %c0_32] : memref<32x1xf32, #tpu.memory_space<vmem>>, vector<32x1xf32>
    %cst_33 = arith.constant dense<0.000000e+00> : vector<2x1xf32>
    %39 = tpu.matmul %35, %17, %cst_33 {dimension_numbers = #tpu.dot_dimension_numbers<[1], [0], [0], [1], [0, 0, 1, 1], [], []>} : vector<2x32xf32>, vector<32x1xf32>, vector<2x1xf32> -> vector<2x1xf32>
    %40 = arith.addf %39, %36 : vector<2x1xf32>
    %cst_34 = arith.constant 0.000000e+00 : f32
    %41 = vector.broadcast %cst_34 : f32 to vector<2x1xf32>
    %42 = arith.maximumf %40, %41 : vector<2x1xf32>
    %cst_35 = arith.constant dense<0.000000e+00> : vector<32x1xf32>
    %43 = tpu.matmul %37, %42, %cst_35 {dimension_numbers = #tpu.dot_dimension_numbers<[1], [0], [0], [1], [0, 0, 1, 1], [], []>} : vector<32x2xf32>, vector<2x1xf32>, vector<32x1xf32> -> vector<32x1xf32>
    %44 = arith.addf %43, %38 : vector<32x1xf32>
    %cst_36 = arith.constant 0.000000e+00 : f32
    %45 = vector.broadcast %cst_36 : f32 to vector<32x1xf32>
    %46 = arith.subf %45, %44 : vector<32x1xf32>
    %47 = math.exp %46 : vector<32x1xf32>
    %cst_37 = arith.constant 1.000000e+00 : f32
    %48 = vector.broadcast %cst_37 : f32 to vector<32x1xf32>
    %49 = arith.addf %48, %47 : vector<32x1xf32>
    %cst_38 = arith.constant 1.000000e+00 : f32
    %50 = vector.broadcast %cst_38 : f32 to vector<32x1xf32>
    %51 = arith.divf %50, %49 : vector<32x1xf32>
    %52 = vector.broadcast %34 : vector<32x1xf32> to vector<32x256xf32>
    %53 = arith.mulf %5, %52 : vector<32x256xf32>
    %54 = arith.addf %1, %53 : vector<32x256xf32>
    %55 = vector.broadcast %51 : vector<32x1xf32> to vector<32x256xf32>
    %56 = arith.mulf %9, %55 : vector<32x256xf32>
    %57 = arith.addf %54, %56 : vector<32x256xf32>
    %c0_39 = arith.constant 0 : index
    %c0_40 = arith.constant 0 : index
    %c0_41 = arith.constant 0 : index
    %58 = vector.load %arg12[%c0_39, %c0_40, %c0_41] : memref<1x32x256xf32, #tpu.memory_space<vmem>>, vector<1x32x256xf32>
    %59 = vector.shape_cast %58 : vector<1x32x256xf32> to vector<32x256xf32>
    %60 = vector.shape_cast %57 : vector<32x256xf32> to vector<1x32x256xf32>
    tpu.vector_store %arg12[%c0_39, %c0_40, %c0_41], %60 {strides = array<i32>} : memref<1x32x256xf32, #tpu.memory_space<vmem>>, vector<1x32x256xf32>,
    return
  }
  func.func @transform_0(%arg0: i32) -> (i32, i32, i32) {
    %c0_i32 = arith.constant 0 : i32
    %c0_i32_0 = arith.constant 0 : i32
    %c0_i32_1 = arith.constant 0 : i32
    return %arg0, %c0_i32, %c0_i32_0 : i32, i32, i32
  }
  func.func @transform_1(%arg0: i32) -> (i32, i32, i32) {
    %c0_i32 = arith.constant 0 : i32
    %c0_i32_0 = arith.constant 0 : i32
    %c0_i32_1 = arith.constant 0 : i32
    return %arg0, %c0_i32, %c0_i32_0 : i32, i32, i32
  }
  func.func @transform_2(%arg0: i32) -> (i32, i32, i32) {
    %c0_i32 = arith.constant 0 : i32
    %c0_i32_0 = arith.constant 0 : i32
    %c0_i32_1 = arith.constant 0 : i32
    return %arg0, %c0_i32, %c0_i32_0 : i32, i32, i32
  }
  func.func @transform_3(%arg0: i32) -> (i32, i32) {
    %c0_i32 = arith.constant 0 : i32
    %c0_i32_0 = arith.constant 0 : i32
    %c0_i32_1 = arith.constant 0 : i32
    return %c0_i32, %c0_i32_0 : i32, i32
  }
  func.func @transform_4(%arg0: i32) -> (i32, i32) {
    %c0_i32 = arith.constant 0 : i32
    %c0_i32_0 = arith.constant 0 : i32
    %c0_i32_1 = arith.constant 0 : i32
    return %c0_i32, %c0_i32_0 : i32, i32
  }
  func.func @transform_5(%arg0: i32) -> (i32, i32) {
    %c0_i32 = arith.constant 0 : i32
    %c0_i32_0 = arith.constant 0 : i32
    %c0_i32_1 = arith.constant 0 : i32
    return %c0_i32, %c0_i32_0 : i32, i32
  }
  func.func @transform_6(%arg0: i32) -> (i32, i32) {
    %c0_i32 = arith.constant 0 : i32
    %c0_i32_0 = arith.constant 0 : i32
    %c0_i32_1 = arith.constant 0 : i32
    return %c0_i32, %c0_i32_0 : i32, i32
  }
  func.func @transform_7(%arg0: i32) -> (i32, i32) {
    %c0_i32 = arith.constant 0 : i32
    %c0_i32_0 = arith.constant 0 : i32
    %c0_i32_1 = arith.constant 0 : i32
    return %c0_i32, %c0_i32_0 : i32, i32
  }
  func.func @transform_8(%arg0: i32) -> (i32, i32) {
    %c0_i32 = arith.constant 0 : i32
    %c0_i32_0 = arith.constant 0 : i32
    %c0_i32_1 = arith.constant 0 : i32
    return %c0_i32, %c0_i32_0 : i32, i32
  }
  func.func @transform_9(%arg0: i32) -> (i32, i32) {
    %c0_i32 = arith.constant 0 : i32
    %c0_i32_0 = arith.constant 0 : i32
    %c0_i32_1 = arith.constant 0 : i32
    return %c0_i32, %c0_i32_0 : i32, i32
  }
  func.func @transform_10(%arg0: i32) -> (i32, i32) {
    %c0_i32 = arith.constant 0 : i32
    %c0_i32_0 = arith.constant 0 : i32
    %c0_i32_1 = arith.constant 0 : i32
    return %c0_i32, %c0_i32_0 : i32, i32
  }
  func.func @transform_11(%arg0: i32) -> (i32, i32, i32) {
    %c0_i32 = arith.constant 0 : i32
    %c0_i32_0 = arith.constant 0 : i32
    %c0_i32_1 = arith.constant 0 : i32
    return %arg0, %c0_i32, %c0_i32_0 : i32, i32, i32
  }
}

</mosaic_0001>

<bundles_post_ra>
// kernel: tpu_custom_call.1
= control target key start
LH: loop header
LB: loop body
LE: loop exit
PB: predicated region body
PF: predicated region fallthrough
CT: control target
= control target key end

     0   :  { %16 = vsyncpa [#allocation3], 0  ;;  %s1696_s0 = inlined_call_operand.hbm [shape: f32[2,32,256], index: 0, kind: input, shape index: {}]   ;;  %s1697_s1 = inlined_call_operand.vmem [shape: f32[2,1,256], index: 1, kind: input, shape index: {}]   ;;  %s1698_s2 = inlined_call_operand.vmem [shape: f32[2,1,256], index: 2, kind: input, shape index: {}]   ;;  %s1699_s3 = inlined_call_operand.vmem [shape: f32[2,32], index: 3, kind: input, shape index: {}]   ;;  %s1700_s4 = inlined_call_operand.vmem [shape: f32[2,1], index: 4, kind: input, shape index: {}]   ;;  %s1701_s5 = inlined_call_operand.vmem [shape: f32[32,2], index: 5, kind: input, shape index: {}]   ;;  %s1702_s6 = inlined_call_operand.vmem [shape: f32[32,1], index: 6, kind: input, shape index: {}]   ;;  %s1703_s7 = inlined_call_operand.vmem [shape: f32[2,32], index: 7, kind: input, shape index: {}]   ;;  %s1704_s8 = inlined_call_operand.vmem [shape: f32[2,1], index: 8, kind: input, shape index: {}]   ;;  %s1705_s9 = inlined_call_operand.vmem [shape: f32[32,2], index: 9, kind: input, shape index: {}]   ;;  %s1706_s10 = inlined_call_operand.vmem [shape: f32[32,1], index: 10, kind: input, shape index: {}]   ;;  %s1707_s11 = inlined_call_operand.hbm [shape: f32[2,32,256], index: 11, kind: output, shape index: {}]  }
   0x1   :  { %18 = vsyncpa [#allocation3 + $0x1], 0 }
   0x2   :  { %19 = vsyncpa [#allocation4], 0 }
   0x3   :  { %21 = vsyncpa [#allocation4 + $0x1], 0  ;;  %s1294_s17 = smov 0   ;;  %s1296_s18 = smov 0  }
   0x4   :  { %s1298_s19 = smov 0   ;;  %s1300_s20 = smov 0  }
   0x5 LB: > { %1713 = sst [smem:[#allocation8_spill]] %s1215_s17  ;;  %s1315_s21 = sadd.s32 4294967295, %s1227_s20   ;;  %s1227_s20 = sphi %s1300_s20, %s1732_s20   ;;  %s1223_s19 = sphi %s1298_s19, %s1734_s19   ;;  %s1219_s18 = sphi %s1296_s18, %s1736_s18   ;;  %s1215_s17 = sphi %s1294_s17, %s1735_s17  }
   0x6   : > { %1714 = sst [smem:[#allocation9_spill]] %s1223_s19  ;;  %s1013_s22 = sadd.s32 4294967294, %s1227_s20  }
   0x7   : > { %s1319_s23 = sadd.s32 1, %s1227_s20   ;;  %s34_s24 = sadd.s32 1, %s1223_s19 }
   0x8   : > { %1715 = sst [smem:[#allocation10_spill]] %s1319_s23  ;;  %s31_s25 = ssub.s32 %s1227_s20, %s1319_s23 }
   0x9   : > { %p41_p0 = scmp.ne.s32.totalorder %s1223_s19, %s1219_s18  ;;  %p32_p1 = scmp.eq.s32.totalorder %s31_s25, 0 }
   0xa   : > { %p42_p2 = scmp.eq.s32.totalorder %s1227_s20, 0  ;;  %p47_p3 = scmp.ne.s32.totalorder %s1219_s18, %s1215_s17 }
   0xb   : > { %p48_p4 = scmp.eq.s32.totalorder %s1315_s21, 0  ;;  %p291_p7 = scmp.eq.s32.totalorder %s1315_s21, 1 }
   0xc   : > { %s1331_s26 = scalar_select %p32_p1, %s1223_s19, %s34_s24  }
   0xd   : > { %p1333_p5 = por %p42_p2, %p41_p0  ;;  %p1337_p6 = por %p48_p4, %p47_p3 }
   0xe   : > { %1716 = sst [smem:[#allocation11_spill]] %s1331_s26  ;;  %p297_p8 = scmp.eq.s32.totalorder %s1013_s22, 1 }
   0xf   : > { %p1057_p10 = scmp.lt.s32.totalorder %s1227_s20, 2  ;;  %p1344_p11 = por %p291_p7, %p41_p0 }
  0x10   : > { %p1348_p12 = por %p297_p8, %p47_p3  ;;  %s341_s12 = sand.u32 1, %s1223_s19  }
  0x11   : > { %s1041_s13 = sshll.u32 %s1227_s20, 6  ;;  %s1016_s14 = sshll.u32 %s341_s12, 6 }
  0x12   : > { %s1720_s30 = scalar_select %p1348_p12, 1, 0 }
  0x13   : > { %s350_s24 = scalar_lea.hbm %s1696_s0, %s1041_s13  ;;  %s345_s22 = scalar_lea.vmem [#allocation2], %s1016_s14 }
  0x14   : > { %1721 = sst [smem:[#allocation12_spill]] %s1720_s30  ;;  %s351_s25 = sshll.u32 %s350_s24, 4  ;;  %s352_s25 = int_to_ptr.hbm [resolvable:$true] %s351_s25 }
  0x15   : > { %s353_s26 = sshll.u32 %s345_s22, 4  ;;  %p1359_p13 = pnand %p1057_p10, %p1333_p5  ;;  %s354_s26 = int_to_ptr.vmem [resolvable:$true] %s353_s26 }
  0x16   : > { %p1019_p0 = scmp.ge.s32.totalorder %s1227_s20, 1  ;;  %p375_p1 = scmp.lt.s32.totalorder %s1227_s20, 3 }
  0x17   : > { %s342_s19 = scalar_lea.sflag [#allocation3], %s341_s12  ;;  %s1131_s30 = sshra.s32 %s352_s25, 4  ;;  %s1132_s30 = int_to_ptr.hbm [resolvable:$true] %s1131_s30 }
  0x18   : > { %s1133_s17 = scalar_lea.hbm %s1132_s30, 64  ;;  %p1135_p3 = pneg %p1359_p13 }
  0x19   : > { %p1134_p2 = scmp.ne.s32.totalorder %s1132_s30, %s1133_s17  ;;  %s1138_s27 = scalar_lea.hbm %s1696_s0, 128 }
  0x1a   : > { %p1139_p5 = scmp.lt.s32.totalorder %s1132_s30, %s1696_s0  ;;  %p1140_p8 = scmp.lt.s32.totalorder %s1138_s27, %s1133_s17 }
  0x1b   : > { %p1136_p4 = pnand %p1135_p3, %p1134_p2 }
  0x1c   : > { %p1141_p10 = por %p1140_p8, %p1139_p5 }
  0x1d   : > { %p1137_p7 = pneg %p1136_p4 }
  0x1f   : > { %p1142_p9 = pnand %p1141_p10, %p1137_p7 }
  0x21   : > { %1145 = shalt.err (!%p1142_p9)
}
  0x22   : > { %s1229_s12 = smov 256   ;;  %s1230_s24 = smov 16  }
  0x23   : > { %1052 = dma.hbm_to_vmem [thread:$0]  (!%p1359_p13), %s352_s25, 1024, %s354_s26, %s342_s19, %s1229_s12, %s1229_s12, %s1230_s24  }
  0x24   : > { %p376_p2 = pnand %p1019_p0, %p375_p1 }
  0x25   : > { %s1380_s22 = sand.u32 (!%p376_p2), 1, %s1219_s18  }
  0x26   : > { %379 = sbr.rel (%p376_p2) target bundleno = 634 (0x27a), region = 64  ;;  %s1020_s17 = sshll.u32 (!%p376_p2), %s1380_s22, 6 }
  0x27   : > { %s382_s30 = scalar_lea.sflag (!%p376_p2), [#allocation3], %s1380_s22  ;;  %s385_s13 = scalar_lea.vmem (!%p376_p2), [#allocation2], %s1020_s17 }
  0x2b   : > { %1206 = dma.done.wait (%p1337_p6), %s382_s30, 1024  }
  0x2c   : > { %1208 = vsyncadd (%p1337_p6), %s382_s30, 4294966272  ;;  %p433_p9 = scmp.lt.s32.totalorder %s1315_s21, 1  ;;  %v1398_v0 = vld [vmem:[%s385_s13 + $0x30] sm:$0xff]  ;;  %v1400_v1 = vld [vmem:[%s385_s13 + $0x38] sm:$0xff]  ;;  %vm519_vm0 = vcmask 261120   ;;  %vm557_vm1 = vcmask 1041408  }
  0x2d   : > { %v1402_v5 = vld [vmem:[%s385_s13 + $0x10] sm:$0xff]  ;;  %v1404_v6 = vld [vmem:[%s385_s13 + $0x18] sm:$0xff]  ;;  %v1418_v14 = vld [vmem:[%s385_s13 + $0x20] sm:$0xff]  ;;  %vm544_vm2 = vcmask 15360   ;;  %s1634_s12 = scalar_lea.vmem [#allocation5], %s1020_s17  ;;  %s1042_s17 = sshll.u32 %s1315_s21, 6 }
  0x2e   : > { %s434_s19 = scalar_select %p433_p9, %s1315_s21, 1  ;;  %v1426_v17 = vld [vmem:[%s385_s13 + $0x28] sm:$0xff]  ;;  %v1428_v18 = vld [vmem:[%s385_s13] sm:$0xff] }
  0x2f   : > { %v1430_v19 = vld [vmem:[%s385_s13 + $0x8] sm:$0xff]  ;;  %v666_v50 = vld [vmem:[%s1703_s7] sm:$0x3]  ;;  %s912_s13 = scalar_lea.hbm %s1707_s11, %s1042_s17  ;;  %s901_s21 = scalar_lea.sflag [#allocation4], %s1380_s22 }
  0x30   : > { %s1022_s23 = sshll.u32 %s434_s19, 1  ;;  %v509_v55 = vld [vmem:[%s1699_s3] sm:$0x3]  ;;  %s913_s19 = sshll.u32 %s1634_s12, 4  ;;  %s914_s19 = int_to_ptr.vmem [resolvable:$true] %s913_s19 }
  0x31   : > { %s440_s14 = scalar_lea.vmem %s1698_s2, %s1022_s23  ;;  %s436_s16 = scalar_lea.vmem %s1697_s1, %s1022_s23  ;;  %v510_v56 = vld [vmem:[%s1700_s4] sm:$0x3] }
  0x32   : > { %v463_v2 = vld [vmem:[%s440_s14] sm:$0x3]  ;;  %s915_s23 = sshll.u32 %s912_s13, 4  ;;  %s1181_s15 = scalar_lea.hbm %s1707_s11, 128  ;;  %s916_s23 = int_to_ptr.hbm [resolvable:$true] %s915_s23 }
  0x33   : > { %v465_v3 = vperm.slane %v463_v2, 0  ;;  %v466_v4 = vperm.slane %v463_v2, 1  ;;  %v449_v7 = vld [vmem:[%s436_s16] sm:$0x3]  ;;  %s1175_s26 = sshra.s32 %s916_s23, 4  ;;  %s1176_s26 = int_to_ptr.hbm [resolvable:$true] %s1175_s26 }
  0x34   : > { %v451_v8 = vperm.slane %v449_v7, 0  ;;  %v452_v9 = vperm.slane %v449_v7, 1  ;;  %v667_v57 = vld [vmem:[%s1704_s8] sm:$0x3]  ;;  %s1177_s25 = scalar_lea.hbm %s1176_s26, 64  ;;  %p1182_p1 = scmp.lt.s32.totalorder %s1176_s26, %s1707_s11 }
  0x35   : > { %v1407_v10 = vmul.f32 %v465_v3, %v1398_v0  ;;  %v1410_v11 = vmul.f32 %v466_v4, %v1400_v1  ;;  %v1413_v12 = vmul.f32 %v465_v3, %v1402_v5  ;;  %v1416_v13 = vmul.f32 %v466_v4, %v1404_v6  ;;  %v511_v2 = vld [vmem:[%s1701_s5] sm:$0xff]  ;;  %p1178_p6 = scmp.ne.s32.totalorder %s1176_s26, %s1177_s25  ;;  %p1183_p3 = scmp.lt.s32.totalorder %s1181_s15, %s1177_s25 }
  0x36   : > { %v1421_v15 = vmul.f32 %v451_v8, %v1398_v0  ;;  %v1424_v16 = vmul.f32 %v452_v9, %v1400_v1  ;;  %v1439_v23 = vmul.f32 %v465_v3, %v1418_v14  ;;  %v1442_v24 = vmul.f32 %v466_v4, %v1426_v17  ;;  %v668_v7 = vld [vmem:[%s1705_s9] sm:$0xff] }
  0x37   : > { %v502_v20 = vadd.f32 %v1410_v11, %v1407_v10  ;;  %v496_v21 = vadd.f32 %v1416_v13, %v1413_v12  ;;  %v1445_v25 = vmul.f32 %v465_v3, %v1428_v18  ;;  %v1448_v26 = vmul.f32 %v466_v4, %v1430_v19  ;;  %v512_v3 = vld [vmem:[%s1701_s5 + $0x8] sm:$0xff]  ;;  %p1179_p13 = pnand %p1178_p6, %p1344_p11  ;;  %p1184_p4 = por %p1183_p3, %p1182_p1 }
  0x38   : > { %v486_v22 = vadd.f32 %v1424_v16, %v1421_v15  ;;  %v1451_v27 = vmul.f32 %v451_v8, %v1418_v14  ;;  %v1454_v28 = vmul.f32 %v452_v9, %v1426_v17  ;;  %v499_v29 = vadd.f32 %v1442_v24, %v1439_v23  ;;  %v669_v4 = vld [vmem:[%s1705_s9 + $0x8] sm:$0xff] }
  0x39   : > { %503 = vadd.xlane.f32.xlu0 %v502_v20  ;;  %497 = vadd.xlane.f32.xlu1 %v496_v21  ;;  %v493_v30 = vadd.f32 %v1448_v26, %v1445_v25  ;;  %v1463_v32 = vmul.f32 %v451_v8, %v1402_v5  ;;  %v1466_v33 = vmul.f32 %v452_v9, %v1404_v6  ;;  %v514_v20 = vld [vmem:[%s1701_s5 + $0x18] sm:$0xff]  ;;  %p1180_p0 = pneg %p1179_p13 }
  0x3a   : > { %487 = vadd.xlane.f32.xlu2 %v486_v22  ;;  %v483_v31 = vadd.f32 %v1454_v28, %v1451_v27  ;;  %v1469_v34 = vmul.f32 %v451_v8, %v1428_v18  ;;  %v1472_v35 = vmul.f32 %v452_v9, %v1430_v19  ;;  %v513_v8 = vld [vmem:[%s1701_s5 + $0x10] sm:$0xff]  ;;  %v671_v21 = vld [vmem:[%s1705_s9 + $0x18] sm:$0xff]  ;;  %v515_v22 = vld [vmem:[%s1702_s6] sm:$0xff] }
  0x3b   : > { %v480_v36 = vadd.f32 %v1466_v33, %v1463_v32  ;;  %v670_v9 = vld [vmem:[%s1705_s9 + $0x10] sm:$0xff]  ;;  %p1185_p7 = pnand %p1184_p4, %p1180_p0 }
  0x3c   : > { %v477_v37 = vadd.f32 %v1472_v35, %v1469_v34 }
  0x41   : > { %500 = vadd.xlane.f32.xlu0 %v499_v29  ;;  %494 = vadd.xlane.f32.xlu1 %v493_v30  ;;  %v516_v29 = vld [vmem:[%s1702_s6 + $0x8] sm:$0xff] }
  0x42   : > { %484 = vadd.xlane.f32.xlu2 %v483_v31 }
  0x49   : > { %481 = vadd.xlane.f32.xlu0 %v480_v36  ;;  %478 = vadd.xlane.f32.xlu1 %v477_v37 }
  0xac   : > { %v504_v38 = vpop.xlane.xlu0 %503  ;;  %v498_v39 = vpop.xlane.xlu1 %497 }
  0xad   : > { %v508_v40 = vmul.f32 0.00390625, %v504_v38  ;;  %v488_v41 = vpop.xlane.xlu2 %487  ;;  %v506_v48 = vmul.f32 0.00390625, %v498_v39 }
  0xae   : > { %v492_v42 = vmul.f32 0.00390625, %v488_v41 }
  0xaf   : > { %691 = vmatpush.msra.mxu2 %v508_v40  ;;  %v1231_v40 = vmov 0  }
  0xb0   : > { %535 = vmatpush.msra.mxu0 %v492_v42  ;;  %1097 = vset.pattern.permute.xlu0 %v1231_v40  ;;  %v673_v42 = vld [vmem:[%s1706_s10 + $0x8] sm:$0xff] }
  0xb1   : > { %1096 = vset.pattern.permute.xlu2 %v1231_v40  ;;  %1098 = vset.pattern.permute.xlu1 %v1231_v40 }
  0xb4   : > { %v501_v43 = vpop.xlane.xlu0 %500  ;;  %v495_v44 = vpop.xlane.xlu1 %494 }
  0xb5   : > { %v507_v45 = vmul.f32 0.00390625, %v501_v43  ;;  %v485_v46 = vpop.xlane.xlu2 %484  ;;  %v505_v49 = vmul.f32 0.00390625, %v495_v44 }
  0xb6   : > { %v491_v47 = vmul.f32 0.00390625, %v485_v46  ;;  %v672_v46 = vld [vmem:[%s1706_s10] sm:$0xff] }
  0xb7   : > { %692 = vmatpush.msra.mxu2 %v507_v45  ;;  %v517_v45 = vld [vmem:[%s1702_s6 + $0x10] sm:$0xff] }
  0xb8   : > { %536 = vmatpush.msra.mxu0 %v491_v47 }
  0xb9   : > { %693 = vmatpush.msra.mxu2 %v506_v48 }
  0xbb   : > { %694 = vmatpush.msra.mxu2 %v505_v49 }
  0xbc   : > { %v482_v51 = vpop.xlane.xlu0 %481  ;;  %1030 = vmatmul.msk.f32.vlgmr.msra.gmra.mxu2 %vm519_vm0, %v666_v50  ;;  %v479_v52 = vpop.xlane.xlu1 %478 }
  0xbd   : > { %v490_v53 = vmul.f32 0.00390625, %v482_v51  ;;  %v489_v54 = vmul.f32 0.00390625, %v479_v52 }
  0xbf   : > { %537 = vmatpush.msra.mxu0 %v490_v53 }
  0xc1   : > { %538 = vmatpush.msra.mxu0 %v489_v54 }
  0xc2   : > { %1024 = vmatmul.msk.f32.vlgmr.msra.gmra.mxu0 %vm519_vm0, %v509_v55 }
 0x13f   : > { %v540_v58 = vpop.f32.mrf.mxu0  ;;  %v696_v59 = vpop.f32.mrf.mxu2 }
 0x140   : > { %v541_v60 = vadd.f32 %v540_v58, %v510_v56  ;;  %v697_v61 = vadd.f32 %v696_v59, %v667_v57  ;;  %v674_v57 = vld [vmem:[%s1706_s10 + $0x10] sm:$0xff] }
 0x142   : > { %v543_v62 = vmax.f32 %v541_v60, 0.0  ;;  %v699_v63 = vmax.f32 %v697_v61, 0.0 }
 0x144   : > { %1025 = vmatpush.msk.msrb.mxu0 %vm557_vm1, %v543_v62  ;;  %1043 = vmatpush.msk.msra.mxu1 %vm557_vm1, %v543_v62 }
 0x145   : > { %1044 = vmatpush.msk.msra.mxu3 %vm557_vm1, %v699_v63  ;;  %1026 = vmatmul.msk.f32.vlgmr.msrb.gmra.mxu0 %vm544_vm2, %v511_v2  ;;  %v518_v2 = vld [vmem:[%s1702_s6 + $0x18] sm:$0xff] }
 0x146   : > { %1027 = vmatmul.msk.f32.vlgmr.msra.gmra.mxu1 %vm544_vm2, %v512_v3  ;;  %1033 = vmatmul.msk.f32.vlgmr.msra.gmra.mxu3 %vm544_vm2, %v669_v4 }
 0x147   : > { %1031 = vmatpush.msk.msrb.mxu2 %vm557_vm1, %v699_v63 }
 0x148   : > { %1032 = vmatmul.msk.f32.vlgmr.msrb.gmra.mxu2 %vm544_vm2, %v668_v7 }
 0x14e   : > { %1028 = vmatmul.msk.f32.gmra.mxu1 %vm544_vm2, %v513_v8  ;;  %1034 = vmatmul.msk.f32.gmra.mxu3 %vm544_vm2, %v670_v9 }
 0x156   : > { %1029 = vmatmul.msk.f32.gmra.mxu1 %vm544_vm2, %v514_v20  ;;  %1035 = vmatmul.msk.f32.gmra.mxu3 %vm544_vm2, %v671_v21 }
 0x1c2   : > { %v578_v30 = vpop.f32.mrf.mxu0 }
 0x1c3   : > { %v579_v31 = vadd.f32 %v578_v30, %v515_v22  ;;  %v581_v36 = vpop.f32.mrf.mxu1 }
 0x1c4   : > { %v582_v37 = vadd.f32 %v581_v36, %v516_v29  ;;  %v675_v29 = vld [vmem:[%s1706_s10 + $0x18] sm:$0xff] }
 0x1c5   : > { %v590_v38 = vsub.f32 0.0, %v579_v31 }
 0x1c6   : > { %v591_v39 = vsub.f32 0.0, %v582_v37 }
 0x1c7   : > { %v594_v41 = vmul.f32 1.442695, %v590_v38 }
 0x1c8   : > { %v596_v43 = vmul.f32 1.442695, %v591_v39 }
 0x1c9   : > { %1099 = vpow2.f32 %v594_v41  ;;  %v735_v44 = vpop.f32.mrf.mxu3 }
 0x1ca   : > { %1101 = vpow2.f32 %v596_v43  ;;  %v736_v47 = vadd.f32 %v735_v44, %v673_v42 }
 0x1cb   : > { %v584_v48 = vpop.f32.mrf.mxu1  ;;  %v732_v49 = vpop.f32.mrf.mxu2 }
 0x1cc   : > { %v745_v50 = vsub.f32 0.0, %v736_v47  ;;  %v585_v51 = vadd.f32 %v584_v48, %v517_v45  ;;  %v733_v52 = vadd.f32 %v732_v49, %v672_v46 }
 0x1ce   : > { %v750_v53 = vmul.f32 1.442695, %v745_v50  ;;  %v592_v54 = vsub.f32 0.0, %v585_v51  ;;  %v744_v55 = vsub.f32 0.0, %v733_v52 }
 0x1cf   : > { %v1100_v56 = vpop.eup %1099 }
 0x1d0   : > { %v1102_v58 = vpop.eup %1101  ;;  %v602_v59 = vadd.f32 1.0, %v1100_v56  ;;  %1103 = vpow2.f32 %v750_v53  ;;  %v598_v60 = vmul.f32 1.442695, %v592_v54  ;;  %v748_v62 = vmul.f32 1.442695, %v744_v55 }
 0x1d1   : > { %v603_v61 = vadd.f32 1.0, %v1102_v58  ;;  %v738_v63 = vpop.f32.mrf.mxu3 }
 0x1d2   : > { %1105 = vrcp.f32 %v602_v59  ;;  %v739_v3 = vadd.f32 %v738_v63, %v674_v57  ;;  %v617_v39 = vand.u32 2147483648, %v602_v59  ;;  %vm611_vm3 = vweird.f32 %v602_v59 }
 0x1d3   : > { %1107 = vrcp.f32 %v603_v61  ;;  %v587_v4 = vpop.f32.mrf.mxu1  ;;  %v615_v46 = vand.u32 2147483647, %v602_v59  ;;  %v630_v50 = vand.u32 2147483647, %v603_v61  ;;  %v632_v51 = vand.u32 2147483648, %v603_v61 }
 0x1d4   : > { %1109 = vpow2.f32 %v598_v60  ;;  %v746_v7 = vsub.f32 0.0, %v739_v3  ;;  %v588_v8 = vadd.f32 %v587_v4, %v518_v2  ;;  %v618_v53 = vor.u32 1.1754944e-38, %v617_v39 }
 0x1d5   : > { %1111 = vpow2.f32 %v748_v62  ;;  %vm616_vm7 = vcmp.eq.f32.partialorder %v615_v46, 8.507059e+37  ;;  %vm626_vm8 = vweird.f32 %v603_v61  ;;  %vm631_vm10 = vcmp.eq.f32.partialorder %v630_v50, 8.507059e+37 }
 0x1d6   : > { %v1104_v9 = vpop.eup %1103  ;;  %v752_v20 = vmul.f32 1.442695, %v746_v7  ;;  %v593_v21 = vsub.f32 0.0, %v588_v8  ;;  %v633_v4 = vor.u32 1.1754944e-38, %v632_v51 }
 0x1d7   : > { %v1543_v22 = vadd.f32 1.0, %v1104_v9 }
 0x1d8   : > { %v1106_v30 = vpop.eup %1105  ;;  %1113 = vpow2.f32 %v752_v20  ;;  %v600_v31 = vmul.f32 1.442695, %v593_v21 }
 0x1d9   : > { %v1108_v36 = vpop.eup %1107  ;;  %1115 = vrcp.f32 %v1543_v22  ;;  %v741_v37 = vpop.f32.mrf.mxu3  ;;  %v607_v38 = vmul.f32 %v1106_v30, %v602_v59  ;;  %vm612_vm4 = vweird.f32 %v1106_v30 }
 0x1da   : > { %v1110_v40 = vpop.eup %1109  ;;  %1117 = vpow2.f32 %v600_v31  ;;  %v742_v41 = vadd.f32 %v741_v37, %v675_v29  ;;  %v622_v42 = vmul.f32 %v1108_v36, %v603_v61  ;;  %vm627_vm5 = vweird.f32 %v1108_v36  ;;  %vm1557_vm6 = vmor %vm611_vm3, %vm612_vm4 }
 0x1db   : > { %v1112_v43 = vpop.eup %1111  ;;  %v1549_v44 = vadd.f32 1.0, %v1110_v40  ;;  %v608_v45 = vsub.f32 1.0, %v607_v38  ;;  %vm628_vm9 = vmor %vm626_vm8, %vm627_vm5 }
 0x1dc   : > { %v1551_v47 = vadd.f32 1.0, %v1112_v43  ;;  %v747_v48 = vsub.f32 0.0, %v742_v41  ;;  %v623_v49 = vsub.f32 1.0, %v622_v42 }
 0x1dd   : > { %1119 = vrcp.f32 %v1549_v44  ;;  %v609_v52 = vmul.f32 %v1106_v30, %v608_v45  ;;  %v645_v31 = vand.u32 2147483647, %v1549_v44  ;;  %vm641_vm13 = vweird.f32 %v1549_v44 }
 0x1de   : > { %v1114_v54 = vpop.eup %1113  ;;  %1121 = vrcp.f32 %v1551_v47  ;;  %v754_v55 = vmul.f32 1.442695, %v747_v48  ;;  %v624_v56 = vmul.f32 %v1108_v36, %v623_v49  ;;  %vm765_vm11 = vweird.f32 %v1551_v47 }
 0x1df   : > { %v1561_v58 = vpop.eup %1115  ;;  %v1563_v60 = vadd.f32 1.0, %v1114_v54  ;;  %v610_v62 = vadd.f32 %v1106_v30, %v609_v52  ;;  %v771_v39 = vand.u32 2147483648, %v1551_v47  ;;  %v769_v43 = vand.u32 2147483647, %v1551_v47 }
 0x1e0   : > { %v1118_v63 = vpop.eup %1117  ;;  %1123 = vpow2.f32 %v754_v55  ;;  %v625_v2 = vadd.f32 %v1108_v36, %v624_v56  ;;  %v776_v9 = vmul.f32 %v1561_v58, %v1543_v22  ;;  %vm1586_vm15 = vcmp.eq.f32.partialorder %v645_v31, 8.507059e+37 }
 0x1e1   : > { %v1565_v3 = vadd.f32 1.0, %v1118_v63  ;;  %v614_v59 = vsel %vm1557_vm6, %v1106_v30, %v610_v62  ;;  %1125 = vrcp.f32 %v1563_v60  ;;  %v647_v30 = vand.u32 2147483648, %v1549_v44 }
 0x1e2   : > { %v629_v7 = vsel %vm628_vm9, %v1108_v36, %v625_v2  ;;  %v619_v8 = vsel %vm616_vm7, %v618_v53, %v614_v59  ;;  %v777_v40 = vsub.f32 1.0, %v776_v9  ;;  %v772_v54 = vor.u32 1.1754944e-38, %v771_v39 }
 0x1e3   : > { %v1120_v20 = vpop.eup %1119  ;;  %1127 = vrcp.f32 %v1565_v3  ;;  %v634_v21 = vsel %vm631_vm10, %v633_v4, %v629_v7  ;;  %822 = vperm.xlu2 %1096, %v619_v8   ;;  %v648_v50 = vor.u32 1.1754944e-38, %v647_v30  ;;  %vm770_vm2 = vcmp.eq.f32.partialorder %v769_v43, 8.507059e+37 }
 0x1e4   : > { %v1122_v61 = vpop.eup %1121  ;;  %827 = vperm.xlu0 %1097, %v634_v21   ;;  %v637_v29 = vmul.f32 %v1120_v20, %v1549_v44  ;;  %vm642_vm14 = vweird.f32 %v1120_v20  ;;  %v778_v44 = vmul.f32 %v1561_v58, %v777_v40  ;;  %vm656_vm3 = vweird.f32 %v1565_v3 }
 0x1e5   : > { %v761_v37 = vmul.f32 %v1122_v61, %v1551_v47  ;;  %vm766_vm12 = vweird.f32 %v1122_v61  ;;  %vm643_vm1 = vmor %vm641_vm13, %vm642_vm14  ;;  %v662_v57 = vand.u32 2147483648, %v1565_v3  ;;  %v660_v59 = vand.u32 2147483647, %v1565_v3 }
 0x1e6   : > { %v1124_v36 = vpop.eup %1123  ;;  %v638_v38 = vsub.f32 1.0, %v637_v29  ;;  %vm1592_vm0 = vmor %vm765_vm11, %vm766_vm12  ;;  %v779_v8 = vadd.f32 %v1561_v58, %v778_v44  ;;  %vm781_vm5 = vweird.f32 %v1561_v58  ;;  %vm780_vm6 = vweird.f32 %v1543_v22 }
 0x1e7   : > { %v1579_v41 = vadd.f32 1.0, %v1124_v36  ;;  %v762_v42 = vsub.f32 1.0, %v761_v37  ;;  %v1582_v45 = vpop.eup %1125  ;;  %v786_v21 = vand.u32 2147483648, %v1543_v22  ;;  %v663_v30 = vor.u32 1.1754944e-38, %v662_v57  ;;  %vm782_vm8 = vmor %vm780_vm6, %vm781_vm5 }
 0x1e8   : > { %v639_v46 = vmul.f32 %v1120_v20, %v638_v38  ;;  %v791_v47 = vmul.f32 %v1582_v45, %v1563_v60  ;;  %vm661_vm9 = vcmp.eq.f32.partialorder %v660_v59, 8.507059e+37  ;;  %v783_v36 = vsel %vm782_vm8, %v1561_v58, %v779_v8 }
 0x1e9   : > { %v1128_v48 = vpop.eup %1127  ;;  %1129 = vrcp.f32 %v1579_v41  ;;  %v763_v51 = vmul.f32 %v1122_v61, %v762_v42  ;;  %v787_v40 = vor.u32 1.1754944e-38, %v786_v21  ;;  %vm796_vm12 = vweird.f32 %v1582_v45 }
 0x1ea   : > { %v640_v52 = vadd.f32 %v1120_v20, %v639_v46  ;;  %v652_v55 = vmul.f32 %v1128_v48, %v1565_v3  ;;  %vm657_vm4 = vweird.f32 %v1128_v48  ;;  %v792_v29 = vsub.f32 1.0, %v791_v47 }
 0x1eb   : > { %v764_v56 = vadd.f32 %v1122_v61, %v763_v51  ;;  %vm658_vm7 = vmor %vm656_vm3, %vm657_vm4  ;;  %vm810_vm13 = vweird.f32 %v1579_v41  ;;  %v814_v58 = vand.u32 2147483647, %v1579_v41  ;;  %v799_v51 = vand.u32 2147483647, %v1563_v60 }
 0x1ec   : > { %v644_v62 = vsel %vm643_vm1, %v1120_v20, %v640_v52  ;;  %v653_v63 = vsub.f32 1.0, %v652_v55  ;;  %v793_v42 = vmul.f32 %v1582_v45, %v792_v29 }
 0x1ed   : > { %v649_v2 = vsel %vm1586_vm15, %v648_v50, %v644_v62  ;;  %v768_v4 = vsel %vm1592_vm0, %v1122_v61, %v764_v56  ;;  %v784_v61 = vand.u32 2147483647, %v1543_v22  ;;  %v816_v22 = vand.u32 2147483648, %v1579_v41 }
 0x1ee   : > { %832 = vperm.xlu1 %1098, %v649_v2   ;;  %v773_v7 = vsel %vm770_vm2, %v772_v54, %v768_v4  ;;  %v654_v9 = vmul.f32 %v1128_v48, %v653_v63  ;;  %v794_v50 = vadd.f32 %v1582_v45, %v793_v42  ;;  %vm795_vm15 = vweird.f32 %v1563_v60 }
 0x1ef   : > { %v1130_v20 = vpop.eup %1129  ;;  %858 = vperm.xlu2 %1096, %v773_v7   ;;  %vm785_vm10 = vcmp.eq.f32.partialorder %v784_v61, 8.507059e+37  ;;  %vm797_vm0 = vmor %vm795_vm15, %vm796_vm12  ;;  %v817_v53 = vor.u32 1.1754944e-38, %v816_v22  ;;  %vm815_vm1 = vcmp.eq.f32.partialorder %v814_v58, 8.507059e+37  ;;  %vm800_vm2 = vcmp.eq.f32.partialorder %v799_v51, 8.507059e+37 }
 0x1f0   : > { %v655_v31 = vadd.f32 %v1128_v48, %v654_v9  ;;  %v806_v37 = vmul.f32 %v1130_v20, %v1579_v41  ;;  %v788_v46 = vsel %vm785_vm10, %v787_v40, %v783_v36  ;;  %vm811_vm11 = vweird.f32 %v1130_v20 }
 0x1f1   : > { %vm812_vm14 = vmor %vm810_vm13, %vm811_vm11  ;;  %v798_v54 = vsel %vm797_vm0, %v1582_v45, %v794_v50 }
 0x1f2   : > { %v659_v38 = vsel %vm658_vm7, %v1128_v48, %v655_v31  ;;  %v807_v39 = vsub.f32 1.0, %v806_v37  ;;  %v801_v48 = vand.u32 2147483648, %v1563_v60 }
 0x1f3   : > { %v664_v43 = vsel %vm661_vm9, %v663_v30, %v659_v38 }
 0x1f4   : > { %v808_v3 = vmul.f32 %v1130_v20, %v807_v39  ;;  %v802_v44 = vor.u32 1.1754944e-38, %v801_v48 }
 0x1f6   : > { %863 = vperm.xlu1 %1098, %v788_v46   ;;  %v809_v49 = vadd.f32 %v1130_v20, %v808_v3  ;;  %v803_v56 = vsel %vm800_vm2, %v802_v44, %v798_v54 }
 0x1f7   : > { %837 = vperm.xlu2 %1096, %v664_v43  }
 0x1f8   : > { %v813_v52 = vsel %vm812_vm14, %v1130_v20, %v809_v49 }
 0x1f9   : > { %v818_v55 = vsel %vm815_vm1, %v817_v53, %v813_v52 }
 0x1fe   : > { %873 = vperm.xlu1 %1098, %v818_v55  }
 0x1ff   : > { %868 = vperm.xlu2 %1096, %v803_v56  }
 0x23d   : > { %v823_v41 = vpop.permute.xlu2 %822 }
 0x23e   : > { %v840_v57 = vmul.f32 %v823_v41, %v1469_v34  ;;  %v841_v62 = vmul.f32 %v823_v41, %v1472_v35 }
 0x240   : > { %v848_v60 = vadd.f32 %v840_v57, %v1428_v18  ;;  %v849_v63 = vadd.f32 %v841_v62, %v1430_v19 }
 0x249   : > { %v859_v47 = vpop.permute.xlu2 %858 }
 0x24a   : > { %v876_v45 = vmul.f32 %v859_v47, %v1445_v25  ;;  %v877_v2 = vmul.f32 %v859_v47, %v1448_v26 }
 0x24c   : > { %v884_v4 = vadd.f32 %v876_v45, %v848_v60  ;;  %v885_v59 = vadd.f32 %v877_v2, %v849_v63 }
 0x24e   : > { %892 = vst [vmem:[%s1634_s12] sm:$0xff] %v884_v4 }
 0x24f   : > { %893 = vst [vmem:[%s1634_s12 + $0x8] sm:$0xff] %v885_v59 }
 0x251   : > { %v838_v34 = vpop.permute.xlu2 %837 }
 0x252   : > { %v847_v30 = vmul.f32 %v838_v34, %v1424_v16 }
 0x256   : > { %v828_v7 = vpop.permute.xlu0 %827 }
 0x257   : > { %v842_v21 = vmul.f32 %v828_v7, %v1463_v32  ;;  %v843_v29 = vmul.f32 %v828_v7, %v1466_v33  ;;  %v846_v33 = vmul.f32 %v838_v34, %v1421_v15 }
 0x259   : > { %v869_v18 = vpop.permute.xlu2 %868 }
 0x25a   : > { %v880_v26 = vmul.f32 %v869_v18, %v1439_v23  ;;  %v881_v8 = vmul.f32 %v869_v18, %v1442_v24  ;;  %v850_v23 = vadd.f32 %v842_v21, %v1402_v5  ;;  %v851_v24 = vadd.f32 %v843_v29, %v1404_v6 }
 0x25b   : > { %v854_v6 = vadd.f32 %v846_v33, %v1398_v0 }
 0x260   : > { %v833_v35 = vpop.permute.xlu1 %832 }
 0x261   : > { %v844_v19 = vmul.f32 %v833_v35, %v1451_v27  ;;  %v845_v25 = vmul.f32 %v833_v35, %v1454_v28 }
 0x263   : > { %v852_v9 = vadd.f32 %v844_v19, %v1418_v14  ;;  %v853_v20 = vadd.f32 %v845_v25, %v1426_v17 }
 0x265   : > { %v888_v61 = vadd.f32 %v880_v26, %v852_v9  ;;  %v889_v27 = vadd.f32 %v881_v8, %v853_v20 }
 0x267   : > { %896 = vst [vmem:[%s1634_s12 + $0x20] sm:$0xff] %v888_v61 }
 0x268   : > { %897 = vst [vmem:[%s1634_s12 + $0x28] sm:$0xff] %v889_v27  ;;  %v864_v28 = vpop.permute.xlu1 %863 }
 0x269   : > { %v878_v14 = vmul.f32 %v864_v28, %v1413_v12  ;;  %v879_v17 = vmul.f32 %v864_v28, %v1416_v13  ;;  %v855_v12 = vadd.f32 %v847_v30, %v1400_v1 }
 0x26b   : > { %v886_v32 = vadd.f32 %v878_v14, %v850_v23  ;;  %v887_v31 = vadd.f32 %v879_v17, %v851_v24 }
 0x26d   : > { %894 = vst [vmem:[%s1634_s12 + $0x10] sm:$0xff] %v886_v32 }
 0x26e   : > { %895 = vst [vmem:[%s1634_s12 + $0x18] sm:$0xff] %v887_v31 }
 0x270   : > { %v874_v5 = vpop.permute.xlu1 %873 }
 0x271   : > { %v882_v13 = vmul.f32 %v874_v5, %v1407_v10  ;;  %v883_v15 = vmul.f32 %v874_v5, %v1410_v11 }
 0x273   : > { %v890_v16 = vadd.f32 %v882_v13, %v854_v6  ;;  %v891_v37 = vadd.f32 %v883_v15, %v855_v12 }
 0x275   : > { %898 = vst [vmem:[%s1634_s12 + $0x30] sm:$0xff] %v890_v16 }
 0x276   : > { %899 = vst [vmem:[%s1634_s12 + $0x38] sm:$0xff] %v891_v37 }
 0x277   : > { %1188 = shalt.err (!%p1185_p7)
}
 0x278   : > { %s1232_s22 = smov 256   ;;  %s1233_s12 = smov 16  }
 0x279   : > { %1047 = dma.vmem_to_hbm [thread:$0]  (%p1344_p11), %s914_s19, 1024, %s916_s23, %s901_s21, %s1232_s22, %s1232_s22, %s1233_s12  }
 0x27a PF: > { %s1729_s17 = sld [smem:[#allocation8_spill]]  ;;  %p1731_p5 = scmp.ge.s32.totalorder %s1227_s20, 2 }
 0x27c   : > { %p1054_p8 = pnand %p1731_p5, %p1348_p12 }
 0x27e   : > { %p1055_p10 = pneg %p1054_p8 }
 0x280   : > { %s930_s30 = sand.u32 1, %s1729_s17  }
 0x281   : > { %s931_s13 = scalar_lea.sflag [#allocation4], %s930_s30 }
 0x282   : > { %1210 = dma.done.wait (%p1055_p10), %s931_s13, 1024  }
 0x283   : > { %1212 = vsyncadd (%p1055_p10), %s931_s13, 4294966272  ;;  %s1732_s20 = sld [smem:[#allocation10_spill]]  ;;  %s1735_s17 = smov %s1219_s18 }
 0x284   : > { %s1733_s26 = sld [smem:[#allocation9_spill]] }
 0x285   : > { %s1734_s19 = sld [smem:[#allocation11_spill]] }
 0x289   : > { %p24_p2 = scmp.ge.s32.totalorder %s1732_s20, 4  }
 0x28a   : > { %s1736_s18 = smov %s1733_s26 }
 0x28b   :  { %26 = sbr.rel (!%p24_p2) target bundleno = 5 (0x5), region = 115 }
 0x290   :  { %937 = vsyncpa [#allocation3], 1 }
 0x291   :  { %939 = vsyncpa [#allocation3 + $0x1], 1 }
 0x292   :  { %940 = vsyncpa [#allocation4], 1 }
 0x293   :  { %942 = vsyncpa [#allocation4 + $0x1], 1 }

</bundles_post_ra>
